<compile_context>
chip_gen: v7x
topology: tpu7x:2x2x1
jax: 0.10.0
libtpu: 0.0.40
codegen_flags: <defaults>
</compile_context>

<pallas_src>
import jax
import jax.numpy as jnp
from jax.experimental import pallas as pl
from jax.experimental.pallas import tpu as pltpu

DEFAULT_MXU_DTYPE = jnp.bfloat16
_F32 = jnp.float32


# ---------------------------------------------------------------------------
# Tile / padding / compiler-param helpers
# ---------------------------------------------------------------------------
def _round_up(x, m):
    return ((x + m - 1) // m) * m


def _pow2_floor(x):
    p = 1
    while p * 2 <= x:
        p *= 2
    return p


def _shrink_for_padding(n, t, floor):
    # keep per-axis zero-padding overhead under ~25%
    while t > floor and (_round_up(n, t) - n) * 4 > n:
        t //= 2
    return t


def _choose_tiles(n, tile_m, tile_k, min_m=16):
    """Power-of-two (tm, tk) tiles + padded problem size.

    tm: multiple of 16 (bf16 sublane packing), capped so the dst-row grid axis
        gets >= 2 tiles when possible (keeps both v7x TensorCores busy).
    tk: multiple of 128 (lane tiling).
    n_pad: common multiple of both tiles (powers of two => lcm == max), so the
        grid never degenerates to a full-extent (1,1) block.
    """
    tm = _pow2_floor(max(min(tile_m, _round_up(n, min_m)), min_m))
    while tm > min_m and -(-n // tm) < 2:
        tm //= 2
    tm = _shrink_for_padding(n, tm, min_m)
    tk = _pow2_floor(max(min(tile_k, _round_up(n, 128)), 128))
    tk = _shrink_for_padding(n, tk, 128)
    n_pad = _round_up(n, max(tm, tk))
    return tm, tk, n_pad


def _pad2(x, rows, cols):
    if x.shape == (rows, cols):
        return x
    return jnp.pad(x, ((0, rows - x.shape[0]), (0, cols - x.shape[1])))


def _pad_rows(x, rows):
    if x.shape[0] == rows:
        return x
    return jnp.pad(x, ((0, rows - x.shape[0]), (0, 0)))


def _vmem_cap_bytes():
    try:
        cap = getattr(pltpu.get_tpu_info(), "vmem_capacity_bytes", None)
        if cap:
            return int(0.85 * cap)
    except Exception:
        pass
    return 54 << 20      # safe even on v7x (64 MiB physical VMEM)


def _vmem_limit_bytes(block_bytes):
    cap = _vmem_cap_bytes()
    want = 3 * int(block_bytes) + (8 << 20)
    return int(min(cap, max(want, 32 << 20)))


# ---------------------------------------------------------------------------
# Branch 1: out_on == False
#   e_new = act( (A_xx + A_yy) @ act_e( (h @ Wt^T) * e ) )
# ---------------------------------------------------------------------------
def _compute_whe(h_feat, e_feat, w_transform, activation_edge, md):
    """Per-source message act_e((h @ Wt^T) * e); depends only on the source row
    so it is computed once over N (previously recomputed per dst tile)."""
    w_h = jnp.dot(h_feat.astype(md), jnp.transpose(w_transform).astype(md),
                  preferred_element_type=_F32)
    whe = w_h * e_feat.astype(_F32)
    if activation_edge is not None:
        whe = activation_edge(whe)
    return whe


def eiconv_prop_forward(h_feat, e_feat, adj_xx, adj_yy, w_transform,
                        activation=None, activation_edge=None,
                        matmul_dtype=DEFAULT_MXU_DTYPE,
                        tile_m=512, tile_k=1024):
    N = h_feat.shape[0]
    edge_feats = e_feat.shape[1]
    md = matmul_dtype
    tm, tk, n_pad = _choose_tiles(N, tile_m, tile_k)
    ni, nk = n_pad // tm, n_pad // tk

    # Hoisted message (cast to bf16 once, streamed per source tile).
    whe = _pad_rows(_compute_whe(h_feat, e_feat, w_transform,
                                 activation_edge, md).astype(md), n_pad)

    # Single summed adjacency stream: values in {0,1,2}, exact in bf16.
    # TODO(synk): cache this across calls and store int8 (v5e/v6e) / fp8 (v7x).
    adj = _pad2((adj_xx + adj_yy).astype(md), n_pad, n_pad)

    def kernel(adj_ref, whe_ref, out_ref):
        k = pl.program_id(1)

        @pl.when(k == 0)
        def _():
            out_ref[...] = jnp.zeros_like(out_ref)

        # accumulate straight into the (f32, k-resident) output block
        out_ref[...] += jnp.dot(adj_ref[...], whe_ref[...],
                                preferred_element_type=_F32)

        if activation is not None:
            @pl.when(k == pl.num_programs(1) - 1)
            def _():
                out_ref[...] = activation(out_ref[...])

    isz = jnp.dtype(md).itemsize
    block_bytes = (2 * tm * tk * isz            # adjacency (double-buffered)
                   + 2 * tk * edge_feats * isz  # whe (double-buffered)
                   + 3 * tm * edge_feats * 4)   # f32 output block + matmul temp

    grid_spec = pltpu.PrefetchScalarGridSpec(
        num_scalar_prefetch=0,
        grid=(ni, nk),
        in_specs=[
            pl.BlockSpec((tm, tk), lambda i, k: (i, k)),          # A_xx + A_yy
            pl.BlockSpec((tk, edge_feats), lambda i, k: (k, 0)),  # whe (src)
        ],
        out_specs=pl.BlockSpec((tm, edge_feats), lambda i, k: (i, 0)),
    )
    out = pl.pallas_call(
        kernel,
        out_shape=jax.ShapeDtypeStruct((n_pad, edge_feats), _F32),
        grid_spec=grid_spec,
        compiler_params=pltpu.CompilerParams(
            dimension_semantics=("parallel", "arbitrary"),
            vmem_limit_bytes=_vmem_limit_bytes(block_bytes)),
    )(adj, whe)
    return out[:N]


# ---------------------------------------------------------------------------
# Branch 2: out_on == True
#   gx = Wxx @ e - rowsum(Wxx)*e ; gy analogously ; h_cat = [h, e, gx, gy]
#   rain  = Rainfall_out(act_e(Rainfall_in(h_cat)))  (+ rain0 if error_mode)
#   h_out = out(h_cat)
#
# Restructured: with u = e @ Wgx (N x wcols),
#   gx @ Wgx = Wxx @ u - rowsum(Wxx) * u_dst,
# so the inner loop accumulates Wxx @ [u | 1] and Wyy @ [v | 1] only; the
# finalize adds the precomputed z_he = h @ Wh + e @ We and is elementwise
# (plus one tiny matmul when activation_edge is not None).
# ---------------------------------------------------------------------------
def _prep_out_weights(w_rain_in, w_rain_out, w_out, in_feats, de, fold, md):
    """Column-stack [W_out^T | rain weights]; fold Rainfall_out when act_e=None."""
    wo_t = jnp.transpose(w_out)                                   # (ef, out)
    if fold:
        w_rain = jnp.dot(jnp.transpose(w_rain_in), jnp.transpose(w_rain_out),
                         preferred_element_type=_F32)             # (ef, 1)
        w2 = jnp.zeros((w_rain_in.shape[0], 1), _F32)             # unused dummy
    else:
        w_rain = jnp.transpose(w_rain_in)                         # (ef, 4*out)
        w2 = jnp.transpose(w_rain_out)                            # (4*out, 1)
    w_all = jnp.concatenate([wo_t, w_rain], axis=1).astype(md)
    wh = w_all[:in_feats]
    we = w_all[in_feats:in_feats + de]
    wgx = w_all[in_feats + de:in_feats + 2 * de]
    wgy = w_all[in_feats + 2 * de:]
    return wh, we, wgx, wgy, w2.astype(md)


def eiconv_prop_forward_out(h_feat, e_feat, wadj_xx, wadj_yy, rain0,
                            w_rain_in, w_rain_out, w_out,
                            activation_edge=None, error_mode=False,
                            matmul_dtype=DEFAULT_MXU_DTYPE,
                            tile_m=512, tile_k=1024):
    N, in_feats = h_feat.shape
    de = e_feat.shape[1]
    ef = w_rain_in.shape[1]
    assert ef == in_feats + 3 * de, "h_cat width must match Linear in_features"
    out_feats = w_out.shape[0]
    fold = activation_edge is None
    md = matmul_dtype

    tm, tk, n_pad = _choose_tiles(N, tile_m, tile_k)
    ni, nk = n_pad // tm, n_pad // tk

    wh, we, wgx, wgy, w2 = _prep_out_weights(w_rain_in, w_rain_out, w_out,
                                             in_feats, de, fold, md)
    wcols = wh.shape[1]                      # out_feats+1 (fold) or 5*out_feats

    h_md = h_feat.astype(md)
    e_md = e_feat.astype(md)
    ones = jnp.ones((N, 1), md)
    # u = e @ Wgx, v = e @ Wgy; ones column fused so rowsum(W) falls out of the
    # same adjacency MXU pass.
    u = jnp.dot(e_md, wgx, preferred_element_type=_F32)
    v = jnp.dot(e_md, wgy, preferred_element_type=_F32)
    u_aug = _pad_rows(jnp.concatenate([u.astype(md), ones], axis=1), n_pad)
    v_aug = _pad_rows(jnp.concatenate([v.astype(md), ones], axis=1), n_pad)
    # dst-row term, hoisted out of the kernel
    z_he = _pad_rows(jnp.dot(h_md, wh, preferred_element_type=_F32)
                     + jnp.dot(e_md, we, preferred_element_type=_F32), n_pad)

    # TODO(synk): weighted adjacency streamed in bf16; keep f32 (2x HBM) if
    # tighter than bf16 precision is required for the gradient differences.
    wxx = _pad2(wadj_xx.astype(md), n_pad, n_pad)
    wyy = _pad2(wadj_yy.astype(md), n_pad, n_pad)

    def kernel(wxx_ref, wyy_ref, uk_ref, vk_ref, zhe_ref, ui_ref, vi_ref,
               w2_ref, out_ref, px_acc, py_acc):
        k = pl.program_id(1)

        @pl.when(k == 0)
        def _():
            px_acc[...] = jnp.zeros_like(px_acc)
            py_acc[...] = jnp.zeros_like(py_acc)

        px_acc[...] += jnp.dot(wxx_ref[...], uk_ref[...],
                               preferred_element_type=_F32)
        py_acc[...] += jnp.dot(wyy_ref[...], vk_ref[...],
                               preferred_element_type=_F32)

        @pl.when(k == pl.num_programs(1) - 1)
        def _():
            px = px_acc[...]
            py = py_acc[...]
            u_d = ui_ref[:, :wcols].astype(_F32)
            v_d = vi_ref[:, :wcols].astype(_F32)
            # rowsum(W) arrived as the last accumulator column (ones trick)
            z = (zhe_ref[...]
                 + px[:, :wcols] - px[:, wcols:wcols + 1] * u_d
                 + py[:, :wcols] - py[:, wcols:wcols + 1] * v_d)
            h_out = z[:, :out_feats]
            if fold:
                rain = z[:, out_feats:out_feats + 1]
            else:
                rain_h = activation_edge(z[:, out_feats:])
                rain = jnp.dot(rain_h.astype(md), w2_ref[...],
                               preferred_element_type=_F32)
            # single lane slab: [h_out | rain]  (kept un-shrunk; see review)
            out_ref[:, :out_feats] = h_out.astype(out_ref.dtype)
            out_ref[:, out_feats:] = rain.astype(out_ref.dtype)

    isz = jnp.dtype(md).itemsize
    block_bytes = (4 * tm * tk * isz                               # Wxx, Wyy (2x each)
                   + 4 * tk * (wcols + 1) * isz                    # u_aug, v_aug (src)
                   + 2 * tm * (wcols * 4 + 2 * (wcols + 1) * isz)  # dst blocks
                   + 4 * tm * (wcols + 1) * 4                      # px/py scratch + temps
                   + 2 * tm * (out_feats + 1) * 4)                 # output slab

    grid_spec = pltpu.PrefetchScalarGridSpec(
        num_scalar_prefetch=0,
        grid=(ni, nk),
        in_specs=[
            pl.BlockSpec((tm, tk), lambda i, k: (i, k)),           # Wxx
            pl.BlockSpec((tm, tk), lambda i, k: (i, k)),           # Wyy
            pl.BlockSpec((tk, wcols + 1), lambda i, k: (k, 0)),    # [u | 1] src
            pl.BlockSpec((tk, wcols + 1), lambda i, k: (k, 0)),    # [v | 1] src
            pl.BlockSpec((tm, wcols), lambda i, k: (i, 0)),        # z_he dst
            pl.BlockSpec((tm, wcols + 1), lambda i, k: (i, 0)),    # [u | 1] dst
            pl.BlockSpec((tm, wcols + 1), lambda i, k: (i, 0)),    # [v | 1] dst
            pl.BlockSpec((w2.shape[0], 1), lambda i, k: (0, 0)),   # W_rain_out^T
        ],
        out_specs=pl.BlockSpec((tm, out_feats + 1), lambda i, k: (i, 0)),
        scratch_shapes=[pltpu.VMEM((tm, wcols + 1), _F32),
                        pltpu.VMEM((tm, wcols + 1), _F32)],
    )
    slab = pl.pallas_call(
        kernel,
        out_shape=jax.ShapeDtypeStruct((n_pad, out_feats + 1), _F32),
        grid_spec=grid_spec,
        compiler_params=pltpu.CompilerParams(
            dimension_semantics=("parallel", "arbitrary"),
            vmem_limit_bytes=_vmem_limit_bytes(block_bytes)),
    )(wxx, wyy, u_aug, v_aug, z_he, u_aug, v_aug, w2)

    h_out = slab[:N, :out_feats]
    rain = slab[:N, out_feats:]
    if error_mode:
        rain = rain0.reshape(-1, 1).astype(_F32) + rain
    return rain, h_out


# ---------------------------------------------------------------------------
# Pure-JAX references
#   *_plain : straight transcription of the PyTorch math in f32
#   *_emul  : same math with the kernel's bf16 casts / weight folding
# ---------------------------------------------------------------------------
def _ref_branch1_plain(h, e, adj_xx, adj_yy, w_transform, activation, activation_edge):
    whe = (h @ w_transform.T) * e
    if activation_edge is not None:
        whe = activation_edge(whe)
    agg = (adj_xx + adj_yy) @ whe
    if activation is not None:
        agg = activation(agg)
    return agg


def _ref_branch1_emul(h, e, adj_xx, adj_yy, w_transform, activation, activation_edge, md):
    whe = _compute_whe(h, e, w_transform, activation_edge, md).astype(md)
    agg = jnp.dot((adj_xx + adj_yy).astype(md), whe, preferred_element_type=_F32)
    if activation is not None:
        agg = activation(agg)
    return agg


def _ref_branch2_plain(h, e, wxx, wyy, rain0, w_rain_in, w_rain_out, w_out,
                       activation_edge, error_mode):
    gx = wxx @ e - jnp.sum(wxx, axis=1, keepdims=True) * e
    gy = wyy @ e - jnp.sum(wyy, axis=1, keepdims=True) * e
    h_cat = jnp.concatenate([h, e, gx, gy], axis=1)
    rain_h = h_cat @ w_rain_in.T
    if activation_edge is not None:
        rain_h = activation_edge(rain_h)
    rain = rain_h @ w_rain_out.T
    if error_mode:
        rain = rain0.reshape(-1, 1) + rain
    return rain, h_cat @ w_out.T


def _ref_branch2_emul(h, e, wxx, wyy, rain0, w_rain_in, w_rain_out, w_out,
                      activation_edge, error_mode, md):
    N, in_feats = h.shape
    de = e.shape[1]
    out_feats = w_out.shape[0]
    fold = activation_edge is None
    wh, we, wgx, wgy, w2 = _prep_out_weights(w_rain_in, w_rain_out, w_out,
                                             in_feats, de, fold, md)
    wcols = wh.shape[1]
    h_md = h.astype(md)
    e_md = e.astype(md)
    ones = jnp.ones((N, 1), md)
    u = jnp.dot(e_md, wgx, preferred_element_type=_F32)
    v = jnp.dot(e_md, wgy, preferred_element_type=_F32)
    u_aug = jnp.concatenate([u.astype(md), ones], axis=1)
    v_aug = jnp.concatenate([v.astype(md), ones], axis=1)
    z_he = (jnp.dot(h_md, wh, preferred_element_type=_F32)
            + jnp.dot(e_md, we, preferred_element_type=_F32))
    px = jnp.dot(wxx.astype(md), u_aug, preferred_element_type=_F32)
    py = jnp.dot(wyy.astype(md), v_aug, preferred_element_type=_F32)
    u_d = u_aug[:, :wcols].astype(_F32)
    v_d = v_aug[:, :wcols].astype(_F32)
    z = (z_he + px[:, :wcols] - px[:, wcols:wcols + 1] * u_d
         + py[:, :wcols] - py[:, wcols:wcols + 1] * v_d)
    h_out = z[:, :out_feats]
    if fold:
        rain = z[:, out_feats:out_feats + 1]
    else:
        rain_h = activation_edge(z[:, out_feats:])
        rain = jnp.dot(rain_h.astype(md), w2, preferred_element_type=_F32)
    if error_mode:
        rain = rain0.reshape(-1, 1) + rain
    return rain, h_out


# ---------------------------------------------------------------------------
# Self-test
# ---------------------------------------------------------------------------
def _assert_close(a, b, name, atol=5e-3, rtol=5e-3):
    if not bool(jnp.allclose(a, b, atol=atol, rtol=rtol)):
        raise AssertionError(f"{name}: max abs err {float(jnp.max(jnp.abs(a - b)))}")


def _assert_close_loose(a, b, name):
    # sanity vs. plain f32 math (differences are bf16 rounding only)
    tol = 0.05 * float(jnp.max(jnp.abs(b))) + 0.2
    err = float(jnp.max(jnp.abs(a - b)))
    if err > tol:
        raise AssertionError(f"{name}: max abs err {err} > {tol}")


if __name__ == "__main__":
    key = jax.random.PRNGKey(0)
    keys = jax.random.split(key, 16)
    N = 256            # small demo size; with TILE=128 this exercises a 2x2 grid
    TILE = 128
    MD = jnp.bfloat16

    # ---------------- Branch 1: out_on=False --------------------------------
    in1, ef1 = 16, 32
    h1 = jax.random.normal(keys[0], (N, in1), jnp.float32)
    e1 = jax.random.normal(keys[1], (N, ef1), jnp.float32)
    adj_xx = (jax.random.uniform(keys[2], (N, N)) < 0.1).astype(jnp.float32)
    adj_yy = (jax.random.uniform(keys[3], (N, N)) < 0.1).astype(jnp.float32)
    w_t = jax.random.normal(keys[4], (ef1, in1), jnp.float32) / jnp.sqrt(float(in1))

    for act, act_e in ((None, None), (jnp.tanh, jax.nn.relu)):
        out1 = eiconv_prop_forward(h1, e1, adj_xx, adj_yy, w_t,
                                   activation=act, activation_edge=act_e,
                                   matmul_dtype=MD, tile_m=TILE, tile_k=TILE)
        out1 = jax.block_until_ready(out1)
        _assert_close(out1, _ref_branch1_emul(h1, e1, adj_xx, adj_yy, w_t,
                                              act, act_e, MD), "branch1")
        if act is None and act_e is None:
            _assert_close_loose(out1, _ref_branch1_plain(h1, e1, adj_xx, adj_yy,
                                                         w_t, act, act_e),
                                "branch1-plain")

    # Non-divisible N exercises the zero-padding path (default big tiles).
    Nr = 200
    out1r = eiconv_prop_forward(h1[:Nr], e1[:Nr], adj_xx[:Nr, :Nr],
                                adj_yy[:Nr, :Nr], w_t,
                                activation=jnp.tanh, activation_edge=None,
                                matmul_dtype=MD)
    out1r = jax.block_until_ready(out1r)
    assert out1r.shape == (Nr, ef1)
    _assert_close(out1r,
                  _ref_branch1_emul(h1[:Nr], e1[:Nr], adj_xx[:Nr, :Nr],
                                    adj_yy[:Nr, :Nr], w_t, jnp.tanh, None, MD),
                  "branch1-padded")

    # ---------------- Branch 2: out_on=True ----------------------------------
    in2, de2, out2 = 8, 8, 8
    ef2 = in2 + 3 * de2                                   # Linear in_features
    h2 = jax.random.normal(keys[5], (N, in2), jnp.float32)
    e2 = jax.random.normal(keys[6], (N, de2), jnp.float32)
    wxx = ((jax.random.uniform(keys[7], (N, N)) < 0.1).astype(jnp.float32)
           * jax.random.uniform(keys[8], (N, N)))
    wyy = ((jax.random.uniform(keys[9], (N, N)) < 0.1).astype(jnp.float32)
           * jax.random.uniform(keys[10], (N, N)))
    rain0 = jax.random.normal(keys[11], (N,), jnp.float32)
    w_rain_in = jax.random.normal(keys[12], (4 * out2, ef2), jnp.float32) / jnp.sqrt(float(ef2))
    w_rain_out = jax.random.normal(keys[13], (1, 4 * out2), jnp.float32) / jnp.sqrt(float(4 * out2))
    w_out = jax.random.normal(keys[14], (out2, ef2), jnp.float32) / jnp.sqrt(float(ef2))

    for act_e, err_mode in ((None, True), (jnp.tanh, False)):
        rain, hout = eiconv_prop_forward_out(h2, e2, wxx, wyy, rain0,
                                             w_rain_in, w_rain_out, w_out,
                                             activation_edge=act_e,
                                             error_mode=err_mode,
                                             matmul_dtype=MD,
                                             tile_m=TILE, tile_k=TILE)
        rain = jax.block_until_ready(rain)
        hout = jax.block_until_ready(hout)
        ref_rain, ref_hout = _ref_branch2_emul(h2, e2, wxx, wyy, rain0,
                                               w_rain_in, w_rain_out, w_out,
                                               act_e, err_mode, MD)
        _assert_close(rain, ref_rain, "rain")
        _assert_close(hout, ref_hout, "h_out")
        if act_e is None:
            p_rain, p_hout = _ref_branch2_plain(h2, e2, wxx, wyy, rain0,
                                                w_rain_in, w_rain_out, w_out,
                                                act_e, err_mode)
            _assert_close_loose(rain, p_rain, "rain-plain")
            _assert_close_loose(hout, p_hout, "h_out-plain")

    print("KERNEL_OK")
</pallas_src>

<mosaic_0001>
module attributes {stable_mosaic.version = 11 : i64} {
  func.func @kernel(%arg0: i32, %arg1: i32, %arg2: memref<128x128xbf16, #tpu.memory_space<vmem>>, %arg3: memref<128x32xbf16, #tpu.memory_space<vmem>>, %arg4: memref<128x32xf32, #tpu.memory_space<vmem>>) attributes {dimension_semantics = [#tpu.dimension_semantics<parallel>, #tpu.dimension_semantics<arbitrary>], iteration_bounds = array<i64: 2, 2>, scalar_prefetch = 0 : i64, scratch_operands = 0 : i64, tpu.core_type = #tpu.core_type<tc>, window_params = [{transform_indices = @transform_0, window_bounds = array<i64: 128, 128>}, {transform_indices = @transform_1, window_bounds = array<i64: 128, 32>}, {transform_indices = @transform_2, window_bounds = array<i64: 128, 32>}]} {
    %c0_i32 = arith.constant 0 : i32
    %0 = arith.cmpi eq, %arg1, %c0_i32 : i32
    %1 = arith.extui %0 : i1 to i32
    %c0_i32_0 = arith.constant 0 : i32
    %2 = arith.cmpi ne, %1, %c0_i32_0 : i32
    scf.if %2 {
      %cst_8 = arith.constant 0.000000e+00 : f32
      %9 = vector.broadcast %cst_8 : f32 to vector<128x32xf32>
      %c0_9 = arith.constant 0 : index
      %c0_10 = arith.constant 0 : index
      %10 = vector.load %arg4[%c0_9, %c0_10] : memref<128x32xf32, #tpu.memory_space<vmem>>, vector<128x32xf32>
      tpu.vector_store %arg4[%c0_9, %c0_10], %9 {strides = array<i32>} : memref<128x32xf32, #tpu.memory_space<vmem>>, vector<128x32xf32>,
    } else {
    }
    %c0 = arith.constant 0 : index
    %c0_1 = arith.constant 0 : index
    %3 = vector.load %arg4[%c0, %c0_1] : memref<128x32xf32, #tpu.memory_space<vmem>>, vector<128x32xf32>
    %c0_2 = arith.constant 0 : index
    %c0_3 = arith.constant 0 : index
    %4 = vector.load %arg2[%c0_2, %c0_3] : memref<128x128xbf16, #tpu.memory_space<vmem>>, vector<128x128xbf16>
    %c0_4 = arith.constant 0 : index
    %c0_5 = arith.constant 0 : index
    %5 = vector.load %arg3[%c0_4, %c0_5] : memref<128x32xbf16, #tpu.memory_space<vmem>>, vector<128x32xbf16>
    %cst = arith.constant dense<0.000000e+00> : vector<128x32xf32>
    %6 = tpu.matmul %4, %5, %cst {dimension_numbers = #tpu.dot_dimension_numbers<[1], [0], [0], [1], [0, 0, 1, 1], [], []>} : vector<128x128xbf16>, vector<128x32xbf16>, vector<128x32xf32> -> vector<128x32xf32>
    %7 = arith.addf %3, %6 : vector<128x32xf32>
    %c0_6 = arith.constant 0 : index
    %c0_7 = arith.constant 0 : index
    %8 = vector.load %arg4[%c0_6, %c0_7] : memref<128x32xf32, #tpu.memory_space<vmem>>, vector<128x32xf32>
    tpu.vector_store %arg4[%c0_6, %c0_7], %7 {strides = array<i32>} : memref<128x32xf32, #tpu.memory_space<vmem>>, vector<128x32xf32>,
    return
  }
  func.func @transform_0(%arg0: i32, %arg1: i32) -> (i32, i32) {
    %c0_i32 = arith.constant 0 : i32
    return %arg0, %arg1 : i32, i32
  }
  func.func @transform_1(%arg0: i32, %arg1: i32) -> (i32, i32) {
    %c0_i32 = arith.constant 0 : i32
    %c0_i32_0 = arith.constant 0 : i32
    return %arg1, %c0_i32 : i32, i32
  }
  func.func @transform_2(%arg0: i32, %arg1: i32) -> (i32, i32) {
    %c0_i32 = arith.constant 0 : i32
    %c0_i32_0 = arith.constant 0 : i32
    return %arg0, %c0_i32 : i32, i32
  }
}

</mosaic_0001>

<bundles_post_ra>
// kernel: tpu_custom_call.1
= control target key start
LH: loop header
LB: loop body
LE: loop exit
PB: predicated region body
PF: predicated region fallthrough
CT: control target
= control target key end

     0   :  { %7 = vsyncpa [#allocation3], 0  ;;  %s1157_s0 = inlined_call_operand.hbm [shape: bf16[256,256], index: 0, kind: input, shape index: {}]   ;;  %s1158_s1 = inlined_call_operand.vmem [shape: bf16[256,32], index: 1, kind: input, shape index: {}]   ;;  %s1159_s2 = inlined_call_operand.vmem [shape: f32[256,32], index: 2, kind: output, shape index: {}]  }
   0x1   :  { %9 = vsyncpa [#allocation3 + $0x1], 0  ;;  %s900_s9 = smov 0   ;;  %s902_s10 = smov 0  }
   0x2   :  { %s904_s11 = smov 0   ;;  %s906_s12 = smov 0  }
   0x3   :  { %s908_s13 = smov 0   ;;  %s910_s14 = smov 0  }
   0x4   :  { %s912_s15 = smov 0   ;;  %s914_s16 = smov 0  }
   0x5 LB: > { %s593_s17 = sadd.s32 4294967295, %s878_s16   ;;  %s24_s18 = sadd.s32 1, %s870_s14  ;;  %s878_s16 = sphi %s914_s16, %s15_s16   ;;  %s874_s15 = sphi %s912_s15, %s1170_s15   ;;  %s870_s14 = sphi %s910_s14, %s1169_s14   ;;  %s866_s13 = sphi %s908_s13, %s1168_s13   ;;  %s862_s12 = sphi %s906_s12, %s1167_s12   ;;  %s858_s11 = sphi %s904_s11, %s1166_s11   ;;  %s854_s10 = sphi %s902_s10, %s1165_s10   ;;  %s850_s9 = sphi %s900_s9, %s1164_s9  }
   0x6   : > { %p25_p0 = scmp.ge.s32.totalorder %s24_s18, 2  ;;  %s27_s19 = sadd.s32 1, %s874_s15 }
   0x7   : > { %s36_s20 = sadd.s32 1, %s858_s11  ;;  %p43_p1 = scmp.ne.s32.totalorder %s858_s11, %s854_s10 }
   0x8   : > { %s1172_s18 = smov (%p25_p0, %s24_s18), 0  ;;  %s1174_s19 = smov (!%p25_p0, %s27_s19), %s874_s15 }
   0x9   : > { %s32_s21 = ssub.s32 %s870_s14, %s1172_s18  ;;  %p44_p2 = scmp.eq.s32.totalorder %s878_s16, 0 }
   0xa   : > { %p29_p3 = scmp.ge.s32.totalorder %s1174_s19, 2  ;;  %p49_p4 = scmp.ne.s32.totalorder %s854_s10, %s850_s9 }
   0xb   : > { %p951_p5 = por %p44_p2, %p43_p1  ;;  %p50_p6 = scmp.eq.s32.totalorder %s593_s17, 0 }
   0xc   : > { %s1176_s19 = smov (%p29_p3, %s1174_s19), 0  ;;  %p697_p8 = scmp.lt.s32.totalorder %s878_s16, 4 }
   0xd   : > { %p957_p7 = por %p50_p6, %p49_p4  ;;  %s31_s24 = ssub.s32 %s874_s15, %s1176_s19 }
   0xe   : > { %s33_s25 = sor.u32 %s32_s21, %s31_s24  ;;  %s125_s26 = sand.u32 1, %s858_s11  }
   0xf   : > { %p34_p9 = scmp.eq.s32.totalorder %s33_s25, 0  ;;  %s597_s27 = sshll.u32 %s125_s26, 6 }
  0x10   : > { %s626_s28 = sshll.u32 %s874_s15, 5  ;;  %s129_s4 = scalar_lea.vmem [#allocation2], %s597_s27 }
  0x11   : > { %s967_s29 = scalar_select %p34_p9, %s858_s11, %s36_s20  }
  0x12   : > { %s135_s30 = sadd.s32 %s870_s14, %s626_s28  ;;  %s138_s5 = sshll.u32 %s129_s4, 4  ;;  %s975_s5 = int_to_ptr.vmem [resolvable:$true] %s138_s5 }
  0x13   : > { %s600_s3 = sshll.u32 %s135_s30, 6  ;;  %p981_p10 = pnand %p697_p8, %p951_p5 }
  0x14   : > { %s973_s8 = scalar_lea.hbm %s1157_s0, %s600_s3  ;;  %s986_s17 = scalar_lea.sflag [#allocation3], %s125_s26 }
  0x15   : > { %s782_s20 = scalar_lea.hbm %s973_s8, 1024  ;;  %p784_p13 = pneg %p981_p10 }
  0x16   : > { %p783_p12 = scmp.ne.s32.totalorder %s973_s8, %s782_s20  ;;  %s787_s24 = scalar_lea.hbm %s1157_s0, 4096 }
  0x17   : > { %p788_p2 = scmp.lt.u32.totalorder %s973_s8, %s1157_s0  ;;  %p789_p3 = scmp.lt.u32.totalorder %s787_s24, %s782_s20 }
  0x18   : > { %p785_p0 = pnand %p784_p13, %p783_p12  ;;  %p791_p5 = scmp.lt.u32.totalorder %s782_s20, %s973_s8 }
  0x19   : > { %p790_p4 = por %p789_p3, %p788_p2 }
  0x1a   : > { %p786_p1 = pneg %p785_p0 }
  0x1b   : > { %p792_p6 = por %p791_p5, %p790_p4 }
  0x1d   : > { %p793_p8 = pnand %p792_p6, %p786_p1 }
  0x1f   : > { %796 = shalt.err (!%p793_p8)
}
  0x20   : > { %s797_s26 = scalar_lea.vmem %s975_s5, 1024  ;;  %s880_s28 = smov [#allocation2]  }
  0x21   : > { %p798_p9 = scmp.ne.s32.totalorder %s975_s5, %s797_s26  ;;  %s802_s30 = sshll.u32 %s880_s28, 4  ;;  %s803_s30 = int_to_ptr.vmem [resolvable:$false] %s802_s30 }
  0x22   : > { %s804_s3 = scalar_lea.vmem %s803_s30, 2048  ;;  %p805_p11 = scmp.lt.s32.totalorder %s975_s5, %s803_s30 }
  0x23   : > { %p800_p12 = pnand %p798_p9, %p784_p13  ;;  %p806_p2 = scmp.lt.s32.totalorder %s804_s3, %s797_s26 }
  0x25   : > { %p801_p0 = pneg %p800_p12  ;;  %p807_p3 = por %p806_p2, %p805_p11 }
  0x27   : > { %p808_p4 = pnand %p807_p3, %p801_p0 }
  0x29   : > { %811 = shalt.err (!%p808_p4)
}
  0x2a   : > { %s881_s4 = smov 128   ;;  %s882_s6 = smov 64  }
  0x2b   : > { %s883_s7 = smov 4   ;;  %p155_p13 = scmp.lt.s32.totalorder %s878_s16, 5 }
  0x2c   : > { %696 = dma.hbm_to_vmem [thread:$0]  (!%p981_p10), %s973_s8, 1024, %s975_s5, %s986_s17, %s881_s4, %s882_s6, %s883_s7  }
  0x2d   : > { %p1163_p1 = scmp.ge.s32.totalorder %s878_s16, 1 }
  0x2f   : > { %p156_p5 = pnand %p1163_p1, %p155_p13 }
  0x30   : > { %s161_s20 = sand.u32 (!%p156_p5), 1, %s854_s10  }
  0x31   : > { %159 = sbr.rel (%p156_p5) target bundleno = 330 (0x14a), region = 28  ;;  %s602_s21 = sshll.u32 (!%p156_p5), %s161_s20, 6 }
  0x32   : > { %s162_s22 = scalar_lea.sflag (!%p156_p5), [#allocation3], %s161_s20  ;;  %s1018_s24 = scalar_lea.vmem (!%p156_p5), [#allocation2], %s602_s21 }
  0x38   : > { %845 = dma.done.wait (%p957_p7), %s162_s22, 1024  }
  0x39   : > { %847 = vsyncadd (%p957_p7), %s162_s22, 4294966272  ;;  %s603_s9 = sshll.u32 %s862_s12, 4  ;;  %s605_s5 = sshll.u32 %s866_s13, 4 }
  0x3a   : > { %p193_p10 = scmp.lt.s32.totalorder %s603_s9, 31  ;;  %p199_p11 = scmp.lt.s32.totalorder %s605_s5, 31 }
  0x3b   : > { %p607_p7 = scmp.ne.s32.totalorder %s862_s12, 0 }
  0x3c   : > { %s1178_s9 = smov (!%p193_p10, %s603_s9), 31  ;;  %s1180_s5 = smov (!%p199_p11, %s605_s5), 31 }
  0x3d   : > { %s604_s8 = sshll.u32 %s1178_s9, 2  ;;  %s606_s26 = sshll.u32 %s1180_s5, 3  ;;  %vm209_vm0 = vcmask (!%p607_p7), 261120   ;;  %v884_v0 = vmov (!%p607_p7), 0.0  }
  0x3e   : > { %s1029_s27 = scalar_lea.vmem %s1158_s1, %s604_s8  ;;  %s1034_s23 = scalar_lea.vmem %s1159_s2, %s606_s26 }
  0x3f   : > { %208 = sbr.rel (%p607_p7) target bundleno = 71 (0x47), region = 36  ;;  %210 = vst.msk [vmem:[%s1034_s23] sm:$0xff] (!%p607_p7), %vm209_vm0, %v884_v0  ;;  %211 = vst.msk [vmem:[%s1034_s23 + $0x8] sm:$0xff] (!%p607_p7), %vm209_vm0, %v884_v0 }
  0x40   : > { %212 = vst.msk [vmem:[%s1034_s23 + $0x10] sm:$0xff] (!%p607_p7), %vm209_vm0, %v884_v0  ;;  %213 = vst.msk [vmem:[%s1034_s23 + $0x18] sm:$0xff] (!%p607_p7), %vm209_vm0, %v884_v0 }
  0x41   : > { %214 = vst.msk [vmem:[%s1034_s23 + $0x20] sm:$0xff] (!%p607_p7), %vm209_vm0, %v884_v0  ;;  %215 = vst.msk [vmem:[%s1034_s23 + $0x28] sm:$0xff] (!%p607_p7), %vm209_vm0, %v884_v0 }
  0x42   : > { %216 = vst.msk [vmem:[%s1034_s23 + $0x30] sm:$0xff] (!%p607_p7), %vm209_vm0, %v884_v0  ;;  %217 = vst.msk [vmem:[%s1034_s23 + $0x38] sm:$0xff] (!%p607_p7), %vm209_vm0, %v884_v0 }
  0x43   : > { %218 = vst.msk [vmem:[%s1034_s23 + $0x40] sm:$0xff] (!%p607_p7), %vm209_vm0, %v884_v0  ;;  %219 = vst.msk [vmem:[%s1034_s23 + $0x48] sm:$0xff] (!%p607_p7), %vm209_vm0, %v884_v0 }
  0x44   : > { %220 = vst.msk [vmem:[%s1034_s23 + $0x50] sm:$0xff] (!%p607_p7), %vm209_vm0, %v884_v0  ;;  %221 = vst.msk [vmem:[%s1034_s23 + $0x58] sm:$0xff] (!%p607_p7), %vm209_vm0, %v884_v0 }
  0x45   : > { %222 = vst.msk [vmem:[%s1034_s23 + $0x60] sm:$0xff] (!%p607_p7), %vm209_vm0, %v884_v0  ;;  %223 = vst.msk [vmem:[%s1034_s23 + $0x68] sm:$0xff] (!%p607_p7), %vm209_vm0, %v884_v0 }
  0x46   : > { %224 = vst.msk [vmem:[%s1034_s23 + $0x70] sm:$0xff] %vm209_vm0, %v884_v0  ;;  %225 = vst.msk [vmem:[%s1034_s23 + $0x78] sm:$0xff] %vm209_vm0, %v884_v0 }
  0x47 PF: > { %v766_v1 = vld [vmem:[%s1029_s27] sm:$0xff]   ;;  %v767_v2 = vld [vmem:[%s1029_s27 + $0x8] sm:$0xff]   ;;  %v768_v3 = vld [vmem:[%s1029_s27 + $0x10] sm:$0xff]   ;;  %vm483_vm1 = vcmask 261120  }
  0x48   : > { %643 = vmatprep.subr.bf16.mxu0 %v766_v1  ;;  %675 = vmatprep.subr.bf16.mxu1 %v766_v1  ;;  %v769_v4 = vld [vmem:[%s1029_s27 + $0x18] sm:$0xff]   ;;  %v774_v5 = vld [vmem:[%s1018_s24] sm:$0xff]   ;;  %v771_v8 = vld [vmem:[%s1029_s27 + $0x28] sm:$0xff]  }
  0x49   : > { %644 = vmatpush3.bf16.msra.mxu0 %v766_v1  ;;  %683 = vmatpush3.bf16.msra.mxu1 %v766_v1  ;;  %v775_v6 = vld [vmem:[%s1018_s24 + $0x20] sm:$0xff]   ;;  %v772_v9 = vld [vmem:[%s1029_s27 + $0x30] sm:$0xff]   ;;  %v773_v10 = vld [vmem:[%s1029_s27 + $0x38] sm:$0xff]  }
  0x4a   : > { %645 = vmatprep.subr.bf16.mxu0 %v767_v2  ;;  %676 = vmatprep.subr.bf16.mxu1 %v767_v2  ;;  %v770_v7 = vld [vmem:[%s1029_s27 + $0x20] sm:$0xff]   ;;  %v776_v11 = vld [vmem:[%s1018_s24 + $0x8] sm:$0xff]   ;;  %v778_v13 = vld [vmem:[%s1018_s24 + $0x10] sm:$0xff]  }
  0x4b   : > { %659 = vmatprep.mubr.bf16.mxu0 %v774_v5  ;;  %667 = vmatprep.mubr.bf16.mxu1 %v775_v6  ;;  %v777_v12 = vld [vmem:[%s1018_s24 + $0x28] sm:$0xff]   ;;  %v779_v14 = vld [vmem:[%s1018_s24 + $0x30] sm:$0xff]   ;;  %v780_v15 = vld [vmem:[%s1018_s24 + $0x18] sm:$0xff]  }
  0x4c   : > { %v781_v16 = vld [vmem:[%s1018_s24 + $0x38] sm:$0xff]   ;;  %v228_v17 = vld [vmem:[%s1034_s23 + $0x10] sm:$0xff]  ;;  %v226_v19 = vld [vmem:[%s1034_s23] sm:$0xff] }
  0x4d   : > { %646 = vmatpush3.bf16.msra.mxu0 %v767_v2  ;;  %684 = vmatpush3.bf16.msra.mxu1 %v767_v2  ;;  %v236_v18 = vld [vmem:[%s1034_s23 + $0x50] sm:$0xff]  ;;  %v234_v20 = vld [vmem:[%s1034_s23 + $0x40] sm:$0xff]  ;;  %v229_v23 = vld [vmem:[%s1034_s23 + $0x18] sm:$0xff] }
  0x4e   : > { %647 = vmatprep.subr.bf16.mxu0 %v768_v3  ;;  %677 = vmatprep.subr.bf16.mxu1 %v768_v3  ;;  %v237_v24 = vld [vmem:[%s1034_s23 + $0x58] sm:$0xff]  ;;  %v227_v29 = vld [vmem:[%s1034_s23 + $0x8] sm:$0xff]  ;;  %v232_v41 = vld [vmem:[%s1034_s23 + $0x30] sm:$0xff] }
  0x4f   : > { %v235_v30 = vld [vmem:[%s1034_s23 + $0x48] sm:$0xff]  ;;  %v240_v42 = vld [vmem:[%s1034_s23 + $0x70] sm:$0xff]  ;;  %v230_v43 = vld [vmem:[%s1034_s23 + $0x20] sm:$0xff] }
  0x50   : > { %v238_v44 = vld [vmem:[%s1034_s23 + $0x60] sm:$0xff]  ;;  %v233_v47 = vld [vmem:[%s1034_s23 + $0x38] sm:$0xff]  ;;  %v231_v53 = vld [vmem:[%s1034_s23 + $0x28] sm:$0xff] }
  0x51   : > { %648 = vmatpush3.bf16.msra.mxu0 %v768_v3  ;;  %685 = vmatpush3.bf16.msra.mxu1 %v768_v3  ;;  %v241_v48 = vld [vmem:[%s1034_s23 + $0x78] sm:$0xff]  ;;  %v239_v54 = vld [vmem:[%s1034_s23 + $0x68] sm:$0xff] }
  0x52   : > { %649 = vmatprep.subr.bf16.mxu0 %v769_v4  ;;  %678 = vmatprep.subr.bf16.mxu1 %v769_v4 }
  0x55   : > { %650 = vmatpush3.bf16.msra.mxu0 %v769_v4  ;;  %686 = vmatpush3.bf16.msra.mxu1 %v769_v4 }
  0x56   : > { %651 = vmatprep.subr.bf16.mxu0 %v770_v7  ;;  %679 = vmatprep.subr.bf16.mxu1 %v770_v7 }
  0x59   : > { %652 = vmatpush3.bf16.msra.mxu0 %v770_v7  ;;  %687 = vmatpush3.bf16.msra.mxu1 %v770_v7 }
  0x5a   : > { %653 = vmatprep.subr.bf16.mxu0 %v771_v8  ;;  %680 = vmatprep.subr.bf16.mxu1 %v771_v8 }
  0x5d   : > { %654 = vmatpush3.bf16.msra.mxu0 %v771_v8  ;;  %688 = vmatpush3.bf16.msra.mxu1 %v771_v8 }
  0x5e   : > { %655 = vmatprep.subr.bf16.mxu0 %v772_v9  ;;  %681 = vmatprep.subr.bf16.mxu1 %v772_v9 }
  0x61   : > { %656 = vmatpush3.bf16.msra.mxu0 %v772_v9  ;;  %689 = vmatpush3.bf16.msra.mxu1 %v772_v9 }
  0x62   : > { %657 = vmatprep.subr.bf16.mxu0 %v773_v10  ;;  %682 = vmatprep.subr.bf16.mxu1 %v773_v10 }
  0x65   : > { %658 = vmatpush3.bf16.msra.mxu0 %v773_v10  ;;  %690 = vmatpush3.bf16.msra.mxu1 %v773_v10 }
  0x68   : > { %660 = vmatmul.mubr.bf16.vlgmr.msra.gmra.mrb[0].mxu0 %v776_v11  ;;  %668 = vmatmul.mubr.bf16.vlgmr.msra.gmra.mrb[0].mxu1 %v777_v12 }
  0x69   : > { %663 = vmatprep.mubr.bf16.mxu0 %v778_v13  ;;  %671 = vmatprep.mubr.bf16.mxu1 %v779_v14 }
  0x70   : > { %664 = vmatmul.mubr.bf16.gmra.mrb[4].mxu0 %v780_v15  ;;  %672 = vmatmul.mubr.bf16.gmra.mrb[4].mxu1 %v781_v16 }
 0x13b   : > { %v661_v21 = vpop.f32.mrb[0].mxu0  ;;  %v669_v22 = vpop.f32.mrb[0].mxu1 }
 0x13c   : > { %v469_v25 = vadd.f32 %v661_v21, %v228_v17  ;;  %v477_v26 = vadd.f32 %v669_v22, %v236_v18  ;;  %v404_v27 = vpop.f32.mrb[1].mxu0  ;;  %v436_v28 = vpop.f32.mrb[1].mxu1 }
 0x13d   : > { %v467_v31 = vadd.f32 %v404_v27, %v226_v19  ;;  %v475_v32 = vadd.f32 %v436_v28, %v234_v20  ;;  %v662_v33 = vpop.f32.mrb[2].mxu0  ;;  %v670_v34 = vpop.f32.mrb[2].mxu1 }
 0x13e   : > { %486 = vst.msk [vmem:[%s1034_s23 + $0x10] sm:$0xff] %vm483_vm1, %v469_v25  ;;  %494 = vst.msk [vmem:[%s1034_s23 + $0x50] sm:$0xff] %vm483_vm1, %v477_v26  ;;  %v470_v35 = vadd.f32 %v662_v33, %v229_v23  ;;  %v478_v36 = vadd.f32 %v670_v34, %v237_v24  ;;  %v407_v37 = vpop.f32.mrb[3].mxu0  ;;  %v439_v38 = vpop.f32.mrb[3].mxu1 }
 0x13f   : > { %484 = vst.msk [vmem:[%s1034_s23] sm:$0xff] %vm483_vm1, %v467_v31  ;;  %492 = vst.msk [vmem:[%s1034_s23 + $0x40] sm:$0xff] %vm483_vm1, %v475_v32  ;;  %v468_v39 = vadd.f32 %v407_v37, %v227_v29  ;;  %v476_v40 = vadd.f32 %v439_v38, %v235_v30 }
 0x140   : > { %487 = vst.msk [vmem:[%s1034_s23 + $0x18] sm:$0xff] %vm483_vm1, %v470_v35  ;;  %495 = vst.msk [vmem:[%s1034_s23 + $0x58] sm:$0xff] %vm483_vm1, %v478_v36 }
 0x141   : > { %485 = vst.msk [vmem:[%s1034_s23 + $0x8] sm:$0xff] %vm483_vm1, %v468_v39  ;;  %493 = vst.msk [vmem:[%s1034_s23 + $0x48] sm:$0xff] %vm483_vm1, %v476_v40 }
 0x143   : > { %v665_v45 = vpop.f32.mrb[4].mxu0  ;;  %v673_v46 = vpop.f32.mrb[4].mxu1 }
 0x144   : > { %v473_v49 = vadd.f32 %v665_v45, %v232_v41  ;;  %v481_v50 = vadd.f32 %v673_v46, %v240_v42  ;;  %v420_v51 = vpop.f32.mrb[5].mxu0  ;;  %v452_v52 = vpop.f32.mrb[5].mxu1 }
 0x145   : > { %v471_v55 = vadd.f32 %v420_v51, %v230_v43  ;;  %v479_v56 = vadd.f32 %v452_v52, %v238_v44  ;;  %v666_v57 = vpop.f32.mrb[6].mxu0  ;;  %v674_v58 = vpop.f32.mrb[6].mxu1 }
 0x146   : > { %490 = vst.msk [vmem:[%s1034_s23 + $0x30] sm:$0xff] %vm483_vm1, %v473_v49  ;;  %498 = vst.msk [vmem:[%s1034_s23 + $0x70] sm:$0xff] %vm483_vm1, %v481_v50  ;;  %v474_v59 = vadd.f32 %v666_v57, %v233_v47  ;;  %v482_v60 = vadd.f32 %v674_v58, %v241_v48  ;;  %v423_v61 = vpop.f32.mrb[7].mxu0  ;;  %v455_v62 = vpop.f32.mrb[7].mxu1 }
 0x147   : > { %488 = vst.msk [vmem:[%s1034_s23 + $0x20] sm:$0xff] %vm483_vm1, %v471_v55  ;;  %496 = vst.msk [vmem:[%s1034_s23 + $0x60] sm:$0xff] %vm483_vm1, %v479_v56  ;;  %v472_v63 = vadd.f32 %v423_v61, %v231_v53  ;;  %v480_v0 = vadd.f32 %v455_v62, %v239_v54 }
 0x148   : > { %491 = vst.msk [vmem:[%s1034_s23 + $0x38] sm:$0xff] %vm483_vm1, %v474_v59  ;;  %499 = vst.msk [vmem:[%s1034_s23 + $0x78] sm:$0xff] %vm483_vm1, %v482_v60 }
 0x149   : > { %489 = vst.msk [vmem:[%s1034_s23 + $0x28] sm:$0xff] %vm483_vm1, %v472_v63  ;;  %497 = vst.msk [vmem:[%s1034_s23 + $0x68] sm:$0xff] %vm483_vm1, %v480_v0 }
 0x14a PF: > { %s15_s16 = sadd.s32 1, %s878_s16   ;;  %s1164_s9 = smov %s854_s10 }
 0x14b   : > { %p12_p6 = scmp.ge.s32.totalorder %s15_s16, 6   ;;  %s1165_s10 = smov %s858_s11 }
 0x14c   : > { %s1166_s11 = smov %s967_s29  ;;  %s1167_s12 = smov %s870_s14 }
 0x14d   : > { %s1168_s13 = smov %s874_s15  ;;  %s1169_s14 = smov %s1172_s18 }
 0x14e   : > { %s1170_s15 = smov %s1176_s19  ;;  %14 = sbr.rel (!%p12_p6) target bundleno = 5 (0x5), region = 75 }
 0x155   :  { %522 = vsyncpa [#allocation3], 1 }
 0x156   :  { %524 = vsyncpa [#allocation3 + $0x1], 1 }

</bundles_post_ra>
